<compile_context>
chip_gen: v7x
topology: tpu7x:2x2x1
jax: 0.10.0
libtpu: 0.0.40
codegen_flags: <defaults>
</compile_context>

<pallas_src>
import functools

import jax
import jax.numpy as jnp
from jax import lax
from jax.experimental import pallas as pl
from jax.experimental.pallas import tpu as pltpu

EPS = 1e-8
_NT = (((1,), (1,)), ((), ()))   # contract last dim of both operands: A @ B^T


def _round_up(x, m):
    return ((x + m - 1) // m) * m


def _fsgb_kernel(f1_ref, f2_ref, w_ref, wsq_ref, out_ref, a_scr,
                 *, num_head, threshold):
    j = pl.program_id(1)

    w = w_ref[...].astype(jnp.float32)            # (Hp, dp)
    wsq = wsq_ref[...].astype(jnp.float32)        # (Hp, dp)

    # ---- f1-side work: the f1 tile is resident across the j axis, so do its
    # normalization once per i and keep the bf16 operand in VMEM scratch. ----
    @pl.when(j == 0)
    def _():
        f1 = f1_ref[...].astype(jnp.float32)      # (tm, dp)
        # Reference fix-up: rows of feature1 that sum to exactly zero get
        # +1e-8.  Exact in-kernel because D is never tiled (padded columns are
        # zero and matched by zero weight columns, so they contribute nothing).
        row_sum = jnp.sum(f1, axis=1, keepdims=True)
        f1 = f1 + jnp.where(row_sum == 0.0, jnp.float32(1e-8), jnp.float32(0.0))

        # Per-row, per-head squared norms via one MXU matmul:
        #   ||f * w_h||^2 = sum_d f_d^2 * w_{h,d}^2 == (f*f) @ (w*w)^T
        n1_sq = lax.dot_general(f1 * f1, wsq, dimension_numbers=_NT,
                                preferred_element_type=jnp.float32)   # (tm, Hp)
        # 1/max(||.||, EPS) == rsqrt(max(||.||^2, EPS^2)); fold in 1/num_head.
        inv1 = lax.rsqrt(jnp.maximum(n1_sq, jnp.float32(EPS * EPS)))
        inv1 = inv1 * jnp.float32(1.0 / num_head)

        a_parts = []
        for h in range(num_head):                 # num_head is small & static
            a_parts.append((f1 * w[h:h + 1, :] * inv1[:, h:h + 1])
                           .astype(jnp.bfloat16))
        a_scr[...] = jnp.concatenate(a_parts, axis=1)   # (tm, H*dp) bf16

    # ---- f2-side work: every grid step ----
    f2 = f2_ref[...].astype(jnp.float32)          # (tn, dp)
    n2_sq = lax.dot_general(f2 * f2, wsq, dimension_numbers=_NT,
                            preferred_element_type=jnp.float32)       # (tn, Hp)
    inv2 = lax.rsqrt(jnp.maximum(n2_sq, jnp.float32(EPS * EPS)))

    b_parts = []
    for h in range(num_head):
        b_parts.append((f2 * w[h:h + 1, :] * inv2[:, h:h + 1])
                       .astype(jnp.bfloat16))
    b = jnp.concatenate(b_parts, axis=1)          # (tn, H*dp) bf16

    # Single fused K = H*dp NT matmul == sum over heads of per-head cosines,
    # already scaled by 1/num_head via inv1.
    s = lax.dot_general(a_scr[...], b, dimension_numbers=_NT,
                        preferred_element_type=jnp.float32)           # (tm, tn)
    out_ref[...] = jnp.where(s < jnp.float32(threshold),
                             jnp.float32(0.0), s).astype(out_ref.dtype)


def feature_similarity_graph(feature1, feature2, weights, *, threshold=0.1,
                             tm_max=512, tn_max=512, out_dtype=jnp.float32):
    """feature1: (N1, D), feature2: (N2, D), weights: (H, D) -> (N1, N2)."""
    f1 = feature1.astype(jnp.float32)
    f2 = feature2.astype(jnp.float32)
    w = weights.astype(jnp.float32)
    num_head, d = w.shape
    n1, n2 = f1.shape[0], f2.shape[0]

    # Global reduction (whole-array early exit) stays in the wrapper: it cannot
    # be decided per-tile.  The zero-row fix-up lives inside the kernel now.
    all_zero = jnp.logical_or(jnp.sum(f1) == 0.0, jnp.sum(f2) == 0.0)

    # ---- tile sizing (VMEM-budgeted, generation aware) ----
    dp = _round_up(d, 128)
    hp = _round_up(num_head, 8)

    vmem_cap_known = True
    try:
        vmem_cap = int(pltpu.get_tpu_info().vmem_capacity_bytes)
    except Exception:  # pragma: no cover - conservative fallback off-TPU
        vmem_cap = 64 * 1024 * 1024
        vmem_cap_known = False
    vmem_limit = int(min(vmem_cap * 3 // 4, 48 * 1024 * 1024))
    tile_budget = vmem_limit * 3 // 5          # headroom for Mosaic temporaries

    out_bytes = jnp.dtype(out_dtype).itemsize

    def footprint(tm, tn):
        # double-buffered I/O blocks + persistent bf16 scratch + per-step temps
        dbuf = 2 * (tm * dp * 4 + tn * dp * 4 + 2 * hp * dp * 4
                    + tm * tn * out_bytes)
        scratch = tm * num_head * dp * 2
        interm = (tn * num_head * dp * 6          # b (bf16) + f32 build temps
                  + tm * num_head * dp * 4        # a build temps (j==0 only)
                  + tm * tn * 4)                  # s before threshold
        return dbuf + scratch + interm

    tm = min(tm_max, _round_up(n1, 16))
    tn = min(tn_max, _round_up(n2, 128))
    while footprint(tm, tn) > tile_budget and (tm > 16 or tn > 128):
        if tn >= tm and tn > 128:
            tn = max(128, _round_up(tn // 2, 128))
        elif tm > 16:
            tm = max(16, _round_up(tm // 2, 16))
        else:
            break

    # On v7x-like parts (64 MiB per-TC VMEM, 2 TensorCores) keep the
    # megacore-sharded i axis at >= 2 blocks when there is real work.
    if (vmem_cap_known and vmem_cap <= 64 * 1024 * 1024
            and pl.cdiv(n1, tm) < 2 and n1 >= 64):
        tm = max(16, _round_up(pl.cdiv(n1, 2), 16))

    n1p = _round_up(n1, tm)
    n2p = _round_up(n2, tn)

    # Zero padding is inert (padded feature columns meet zero weight columns;
    # padded rows are sliced off below).  Skip the copy when already aligned.
    if (n1p, dp) != f1.shape:
        f1p = jnp.zeros((n1p, dp), jnp.float32).at[:n1, :d].set(f1)
    else:
        f1p = f1
    if (n2p, dp) != f2.shape:
        f2p = jnp.zeros((n2p, dp), jnp.float32).at[:n2, :d].set(f2)
    else:
        f2p = f2
    wp = jnp.zeros((hp, dp), jnp.float32).at[:num_head, :d].set(w)
    wp_sq = wp * wp

    grid = (n1p // tm, n2p // tn)
    kernel = functools.partial(_fsgb_kernel, num_head=num_head,
                               threshold=float(threshold))

    flops = (2 * n1p * n2p * num_head * dp            # fused cosine matmuls
             + 2 * (n1p + grid[0] * n2p) * hp * dp)   # norm matmuls
    bytes_accessed = (4 * (n1p * dp + grid[0] * n2p * dp + 2 * hp * dp)
                      + out_bytes * n1p * n2p)

    out = pl.pallas_call(
        kernel,
        out_shape=jax.ShapeDtypeStruct((n1p, n2p), out_dtype),
        grid_spec=pltpu.PrefetchScalarGridSpec(
            num_scalar_prefetch=0,
            grid=grid,
            in_specs=[
                # f1 tile is constant across the inner (j) axis -> resident.
                pl.BlockSpec((tm, dp), lambda i, j: (i, 0)),
                pl.BlockSpec((tn, dp), lambda i, j: (j, 0)),
                pl.BlockSpec((hp, dp), lambda i, j: (0, 0)),   # weights
                pl.BlockSpec((hp, dp), lambda i, j: (0, 0)),   # weights^2
            ],
            out_specs=pl.BlockSpec((tm, tn), lambda i, j: (i, j)),
            scratch_shapes=[pltpu.VMEM((tm, num_head * dp), jnp.bfloat16)],
        ),
        compiler_params=pltpu.CompilerParams(
            # j must sweep 0..last per i so the hoisted scratch is valid.
            dimension_semantics=("parallel", "arbitrary"),
            vmem_limit_bytes=vmem_limit,
        ),
        cost_estimate=pl.CostEstimate(
            flops=int(flops),
            transcendentals=int(hp * (n1p + grid[0] * n2p)),
            bytes_accessed=int(bytes_accessed),
        ),
    )(f1p, f2p, wp, wp_sq)

    out = out[:n1, :n2]
    return jnp.where(all_zero, jnp.zeros_like(out), out)


def _reference(feature1, feature2, weights, *, threshold):
    """Pure-JAX f32 port of the PyTorch module. Returns (thresholded, pre-threshold)."""
    f1 = feature1.astype(jnp.float32)
    f2 = feature2.astype(jnp.float32)
    w = weights.astype(jnp.float32)
    all_zero = jnp.logical_or(jnp.sum(f1) == 0.0, jnp.sum(f2) == 0.0)
    rs = jnp.sum(f1, axis=1, keepdims=True)
    f1 = f1 + jnp.where(rs == 0.0, 1e-8, 0.0)
    s = jnp.zeros((f1.shape[0], f2.shape[0]), jnp.float32)
    for i in range(w.shape[0]):
        a = f1 * w[i]
        b = f2 * w[i]
        an = jnp.sqrt(jnp.sum(a * a, axis=1, keepdims=True))
        bn = jnp.sqrt(jnp.sum(b * b, axis=1, keepdims=True))
        s = s + (a / jnp.maximum(an, EPS)) @ (b / jnp.maximum(bn, EPS)).T
    s = s / w.shape[0]
    pre = s
    s = jnp.where(s < threshold, 0.0, s)
    s = jnp.where(all_zero, jnp.zeros_like(s), s)
    return s, pre


def _xavier_uniform_weights(key, num_head, dim):
    # nn.init.xavier_uniform_ on a (1, dim) tensor: fan_in=dim, fan_out=1.
    bound = (6.0 / (dim + 1)) ** 0.5
    keys = jax.random.split(key, num_head)
    ws = [jax.random.uniform(k, (1, dim), jnp.float32, -bound, bound) for k in keys]
    return jnp.concatenate(ws, axis=0)            # (num_head, dim)


if __name__ == "__main__":
    key = jax.random.PRNGKey(0)
    k1, k2, kw = jax.random.split(key, 3)

    N1, N2, DIM, NUM_HEAD = 8, 16, 128, 2
    THRESHOLD = 0.1

    feature1 = jax.random.normal(k1, (N1, DIM), jnp.float32)
    feature2 = jax.random.normal(k2, (N2, DIM), jnp.float32)
    # make one row of feature1 exactly zero to exercise the zero-row (+1e-8) path
    feature1 = feature1.at[3].set(0.0)

    weights = _xavier_uniform_weights(kw, NUM_HEAD, DIM)

    out = feature_similarity_graph(feature1, feature2, weights, threshold=THRESHOLD)
    jax.block_until_ready(out)

    assert out.shape == (N1, N2)
    assert bool(jnp.all(jnp.isfinite(out)))

    # Sanity check vs the f32 reference.  bf16 MXU operands introduce ~1e-2
    # absolute error on cosine values, so skip entries sitting right at the
    # threshold discontinuity and use a matching tolerance elsewhere.
    ref, pre = _reference(feature1, feature2, weights, threshold=THRESHOLD)
    away_from_threshold = jnp.abs(pre - THRESHOLD) > 3e-2
    err = jnp.max(jnp.where(away_from_threshold, jnp.abs(out - ref), 0.0))
    assert float(err) < 2e-2, float(err)

    # All-zero early-exit path.
    out_zero = feature_similarity_graph(jnp.zeros_like(feature1), feature2,
                                        weights, threshold=THRESHOLD)
    jax.block_until_ready(out_zero)
    assert float(jnp.max(jnp.abs(out_zero))) == 0.0

    print("KERNEL_OK")
</pallas_src>

<mosaic_0001>
module attributes {stable_mosaic.version = 11 : i64} {
  func.func @_fsgb_kernel(%arg0: i32, %arg1: i32, %arg2: memref<16x128xf32, #tpu.memory_space<vmem>>, %arg3: memref<128x128xf32, #tpu.memory_space<vmem>>, %arg4: memref<8x128xf32, #tpu.memory_space<vmem>>, %arg5: memref<8x128xf32, #tpu.memory_space<vmem>>, %arg6: memref<16x128xf32, #tpu.memory_space<vmem>>, %arg7: memref<16x256xbf16, #tpu.memory_space<vmem>>) attributes {dimension_semantics = [#tpu.dimension_semantics<parallel>, #tpu.dimension_semantics<arbitrary>], iteration_bounds = array<i64: 1, 1>, scalar_prefetch = 0 : i64, scratch_operands = 1 : i64, tpu.core_type = #tpu.core_type<tc>, window_params = [{transform_indices = @transform_0, window_bounds = array<i64: 16, 128>}, {transform_indices = @transform_1, window_bounds = array<i64: 128, 128>}, {pipeline_mode = #tpu.pipeline_mode<synchronous>, transform_indices = @transform_2, window_bounds = array<i64: 8, 128>}, {pipeline_mode = #tpu.pipeline_mode<synchronous>, transform_indices = @transform_3, window_bounds = array<i64: 8, 128>}, {transform_indices = @transform_4, window_bounds = array<i64: 16, 128>}]} {
    %c0 = arith.constant 0 : index
    %c0_0 = arith.constant 0 : index
    %0 = vector.load %arg4[%c0, %c0_0] : memref<8x128xf32, #tpu.memory_space<vmem>>, vector<8x128xf32>
    %c0_1 = arith.constant 0 : index
    %c0_2 = arith.constant 0 : index
    %1 = vector.load %arg5[%c0_1, %c0_2] : memref<8x128xf32, #tpu.memory_space<vmem>>, vector<8x128xf32>
    %c0_i32 = arith.constant 0 : i32
    %2 = arith.cmpi eq, %arg1, %c0_i32 : i32
    %3 = arith.extui %2 : i1 to i32
    %c0_i32_3 = arith.constant 0 : i32
    %4 = arith.cmpi ne, %3, %c0_i32_3 : i32
    scf.if %4 {
      %c0_14 = arith.constant 0 : index
      %c0_15 = arith.constant 0 : index
      %33 = vector.load %arg2[%c0_14, %c0_15] : memref<16x128xf32, #tpu.memory_space<vmem>>, vector<16x128xf32>
      %cst_16 = arith.constant dense<0.000000e+00> : vector<16xf32>
      %34 = vector.multi_reduction <add>, %33, %cst_16 [1] : vector<16x128xf32> to vector<16xf32>
      %35 = vector.shape_cast %34 : vector<16xf32> to vector<16x1xf32>
      %cst_17 = arith.constant 0.000000e+00 : f32
      %36 = vector.broadcast %cst_17 : f32 to vector<16x1xf32>
      %37 = arith.cmpf oeq, %35, %36 : vector<16x1xf32>
      %cst_18 = arith.constant 9.99999993E-9 : f32
      %cst_19 = arith.constant 0.000000e+00 : f32
      %38 = vector.broadcast %cst_18 : f32 to vector<16x1xf32>
      %39 = vector.broadcast %cst_19 : f32 to vector<16x1xf32>
      %40 = arith.select %37, %38, %39 : vector<16x1xi1>, vector<16x1xf32>
      %41 = vector.broadcast %40 : vector<16x1xf32> to vector<16x128xf32>
      %42 = arith.addf %33, %41 : vector<16x128xf32>
      %43 = arith.mulf %42, %42 : vector<16x128xf32>
      %cst_20 = arith.constant dense<0.000000e+00> : vector<16x8xf32>
      %44 = tpu.matmul %43, %1, %cst_20 {dimension_numbers = #tpu.dot_dimension_numbers<[1], [1], [0], [0], [0, 0, 1, 0], [], []>} : vector<16x128xf32>, vector<8x128xf32>, vector<16x8xf32> -> vector<16x8xf32>
      %cst_21 = arith.constant 1.000000e-16 : f32
      %45 = vector.broadcast %cst_21 : f32 to vector<16x8xf32>
      %46 = arith.maximumf %44, %45 : vector<16x8xf32>
      %47 = math.rsqrt %46 : vector<16x8xf32>
      %cst_22 = arith.constant 5.000000e-01 : f32
      %48 = vector.broadcast %cst_22 : f32 to vector<16x8xf32>
      %49 = arith.mulf %47, %48 : vector<16x8xf32>
      %50 = vector.extract_strided_slice %0 {offsets = [0, 0], sizes = [1, 128], strides = [1, 1]} : vector<8x128xf32> to vector<1x128xf32>
      %51 = vector.broadcast %50 : vector<1x128xf32> to vector<16x128xf32>
      %52 = arith.mulf %42, %51 : vector<16x128xf32>
      %53 = vector.extract_strided_slice %49 {offsets = [0, 0], sizes = [16, 1], strides = [1, 1]} : vector<16x8xf32> to vector<16x1xf32>
      %54 = vector.broadcast %53 : vector<16x1xf32> to vector<16x128xf32>
      %55 = arith.mulf %52, %54 : vector<16x128xf32>
      %56 = arith.truncf %55 : vector<16x128xf32> to vector<16x128xbf16>
      %57 = vector.extract_strided_slice %0 {offsets = [1, 0], sizes = [1, 128], strides = [1, 1]} : vector<8x128xf32> to vector<1x128xf32>
      %58 = vector.broadcast %57 : vector<1x128xf32> to vector<16x128xf32>
      %59 = arith.mulf %42, %58 : vector<16x128xf32>
      %60 = vector.extract_strided_slice %49 {offsets = [0, 1], sizes = [16, 1], strides = [1, 1]} : vector<16x8xf32> to vector<16x1xf32>
      %61 = vector.broadcast %60 : vector<16x1xf32> to vector<16x128xf32>
      %62 = arith.mulf %59, %61 : vector<16x128xf32>
      %63 = arith.truncf %62 : vector<16x128xf32> to vector<16x128xbf16>
      %64 = tpu.concatenate %56, %63 in 1 : vector<16x128xbf16>, vector<16x128xbf16> -> vector<16x256xbf16>
      %c0_23 = arith.constant 0 : index
      %c0_24 = arith.constant 0 : index
      %65 = vector.load %arg7[%c0_23, %c0_24] : memref<16x256xbf16, #tpu.memory_space<vmem>>, vector<16x256xbf16>
      tpu.vector_store %arg7[%c0_23, %c0_24], %64 {strides = array<i32>} : memref<16x256xbf16, #tpu.memory_space<vmem>>, vector<16x256xbf16>,
    } else {
    }
    %c0_4 = arith.constant 0 : index
    %c0_5 = arith.constant 0 : index
    %5 = vector.load %arg3[%c0_4, %c0_5] : memref<128x128xf32, #tpu.memory_space<vmem>>, vector<128x128xf32>
    %6 = arith.mulf %5, %5 : vector<128x128xf32>
    %cst = arith.constant dense<0.000000e+00> : vector<128x8xf32>
    %7 = tpu.matmul %6, %1, %cst {dimension_numbers = #tpu.dot_dimension_numbers<[1], [1], [0], [0], [0, 0, 1, 0], [], []>} : vector<128x128xf32>, vector<8x128xf32>, vector<128x8xf32> -> vector<128x8xf32>
    %cst_6 = arith.constant 1.000000e-16 : f32
    %8 = vector.broadcast %cst_6 : f32 to vector<128x8xf32>
    %9 = arith.maximumf %7, %8 : vector<128x8xf32>
    %10 = math.rsqrt %9 : vector<128x8xf32>
    %11 = vector.extract_strided_slice %0 {offsets = [0, 0], sizes = [1, 128], strides = [1, 1]} : vector<8x128xf32> to vector<1x128xf32>
    %12 = vector.broadcast %11 : vector<1x128xf32> to vector<128x128xf32>
    %13 = arith.mulf %5, %12 : vector<128x128xf32>
    %14 = vector.extract_strided_slice %10 {offsets = [0, 0], sizes = [128, 1], strides = [1, 1]} : vector<128x8xf32> to vector<128x1xf32>
    %15 = vector.broadcast %14 : vector<128x1xf32> to vector<128x128xf32>
    %16 = arith.mulf %13, %15 : vector<128x128xf32>
    %17 = arith.truncf %16 : vector<128x128xf32> to vector<128x128xbf16>
    %18 = vector.extract_strided_slice %0 {offsets = [1, 0], sizes = [1, 128], strides = [1, 1]} : vector<8x128xf32> to vector<1x128xf32>
    %19 = vector.broadcast %18 : vector<1x128xf32> to vector<128x128xf32>
    %20 = arith.mulf %5, %19 : vector<128x128xf32>
    %21 = vector.extract_strided_slice %10 {offsets = [0, 1], sizes = [128, 1], strides = [1, 1]} : vector<128x8xf32> to vector<128x1xf32>
    %22 = vector.broadcast %21 : vector<128x1xf32> to vector<128x128xf32>
    %23 = arith.mulf %20, %22 : vector<128x128xf32>
    %24 = arith.truncf %23 : vector<128x128xf32> to vector<128x128xbf16>
    %25 = tpu.concatenate %17, %24 in 1 : vector<128x128xbf16>, vector<128x128xbf16> -> vector<128x256xbf16>
    %c0_7 = arith.constant 0 : index
    %c0_8 = arith.constant 0 : index
    %26 = vector.load %arg7[%c0_7, %c0_8] : memref<16x256xbf16, #tpu.memory_space<vmem>>, vector<16x256xbf16>
    %cst_9 = arith.constant dense<0.000000e+00> : vector<16x128xf32>
    %27 = tpu.matmul %26, %25, %cst_9 {dimension_numbers = #tpu.dot_dimension_numbers<[1], [1], [0], [0], [0, 0, 1, 0], [], []>} : vector<16x256xbf16>, vector<128x256xbf16>, vector<16x128xf32> -> vector<16x128xf32>
    %cst_10 = arith.constant 1.000000e-01 : f32
    %28 = vector.broadcast %cst_10 : f32 to vector<16x128xf32>
    %29 = arith.cmpf olt, %27, %28 : vector<16x128xf32>
    %cst_11 = arith.constant 0.000000e+00 : f32
    %30 = vector.broadcast %cst_11 : f32 to vector<16x128xf32>
    %31 = arith.select %29, %30, %27 : vector<16x128xi1>, vector<16x128xf32>
    %c0_12 = arith.constant 0 : index
    %c0_13 = arith.constant 0 : index
    %32 = vector.load %arg6[%c0_12, %c0_13] : memref<16x128xf32, #tpu.memory_space<vmem>>, vector<16x128xf32>
    tpu.vector_store %arg6[%c0_12, %c0_13], %31 {strides = array<i32>} : memref<16x128xf32, #tpu.memory_space<vmem>>, vector<16x128xf32>,
    return
  }
  func.func @transform_0(%arg0: i32, %arg1: i32) -> (i32, i32) {
    %c0_i32 = arith.constant 0 : i32
    %c0_i32_0 = arith.constant 0 : i32
    return %arg0, %c0_i32 : i32, i32
  }
  func.func @transform_1(%arg0: i32, %arg1: i32) -> (i32, i32) {
    %c0_i32 = arith.constant 0 : i32
    %c0_i32_0 = arith.constant 0 : i32
    return %arg1, %c0_i32 : i32, i32
  }
  func.func @transform_2(%arg0: i32, %arg1: i32) -> (i32, i32) {
    %c0_i32 = arith.constant 0 : i32
    %c0_i32_0 = arith.constant 0 : i32
    %c0_i32_1 = arith.constant 0 : i32
    return %c0_i32, %c0_i32_0 : i32, i32
  }
  func.func @transform_3(%arg0: i32, %arg1: i32) -> (i32, i32) {
    %c0_i32 = arith.constant 0 : i32
    %c0_i32_0 = arith.constant 0 : i32
    %c0_i32_1 = arith.constant 0 : i32
    return %c0_i32, %c0_i32_0 : i32, i32
  }
  func.func @transform_4(%arg0: i32, %arg1: i32) -> (i32, i32) {
    %c0_i32 = arith.constant 0 : i32
    return %arg0, %arg1 : i32, i32
  }
}

</mosaic_0001>

<bundles_post_ra>
// kernel: tpu_custom_call.1
= control target key start
LH: loop header
LB: loop body
LE: loop exit
PB: predicated region body
PF: predicated region fallthrough
CT: control target
= control target key end

     0   :  { %9 = vsyncpa [#allocation4], 0  ;;  %s1230_s0 = inlined_call_operand.hbm [shape: f32[16,128], index: 0, kind: input, shape index: {}]   ;;  %s1231_s1 = inlined_call_operand.hbm [shape: f32[128,128], index: 1, kind: input, shape index: {}]   ;;  %s1232_s2 = inlined_call_operand.hbm [shape: f32[8,128], index: 2, kind: input, shape index: {}]   ;;  %s1233_s3 = inlined_call_operand.vmem [shape: f32[8,128], index: 3, kind: input, shape index: {}]   ;;  %s1234_s4 = inlined_call_operand.hbm [shape: f32[16,128], index: 4, kind: output, shape index: {}]  }
   0x1   :  { %10 = vsyncpa [#allocation7], 0 }
   0x2   :  { %11 = vsyncpa [#allocation5], 0  ;;  %s925_s15 = smov [#allocation6]   ;;  %s926_s17 = smov [#allocation3]  }
   0x3   :  { %s29_s16 = sshll.u32 %s925_s15, 4  ;;  %s17_s18 = sshll.u32 %s926_s17, 4  ;;  %s30_s16 = int_to_ptr.vmem [resolvable:$true] %s29_s16  ;;  %s959_s18 = int_to_ptr.vmem [resolvable:$true] %s17_s18 }
   0x4   :  { %s831_s21 = scalar_lea.hbm %s1231_s1, 2048 }
   0x5   :  { %p832_p0 = scmp.ne.s32.totalorder %s1231_s1, %s831_s21  ;;  %p835_p1 = scmp.lt.u32.totalorder %s831_s21, %s1231_s1 }
   0x7   :  { %p837_p2 = pnand %p835_p1, %p832_p0 }
   0x9   :  { %840 = shalt.err (!%p837_p2)
}
   0xa   :  { %s841_s26 = scalar_lea.vmem %s30_s16, 2048  ;;  %p846_p4 = scmp.lt.s32.totalorder %s30_s16, %s30_s16 }
   0xb   :  { %p842_p3 = scmp.ne.s32.totalorder %s30_s16, %s841_s26  ;;  %p847_p5 = scmp.lt.s32.totalorder %s841_s26, %s841_s26 }
   0xd   :  { %p848_p6 = por %p847_p5, %p846_p4 }
   0xf   :  { %p849_p7 = pnand %p848_p6, %p842_p3 }
  0x11   :  { %852 = shalt.err (!%p849_p7)
}
  0x12   :  { %s927_s27 = smov 128   ;;  %s928_s28 = smov 8  }
  0x13   :  { %35 = dma.hbm_to_vmem [thread:$0]  %s1231_s1, 2048, %s30_s16, [#allocation7], %s927_s27, %s927_s27, %s928_s28  }
  0x14   :  { %s853_s7 = scalar_lea.hbm %s1230_s0, 256 }
  0x15   :  { %p854_p8 = scmp.ne.s32.totalorder %s1230_s0, %s853_s7  ;;  %p857_p9 = scmp.lt.u32.totalorder %s853_s7, %s1230_s0 }
  0x17   :  { %p859_p10 = pnand %p857_p9, %p854_p8 }
  0x19   :  { %862 = shalt.err (!%p859_p10)
}
  0x1a   :  { %s863_s12 = scalar_lea.vmem %s959_s18, 256  ;;  %p868_p12 = scmp.lt.s32.totalorder %s959_s18, %s959_s18 }
  0x1b   :  { %p864_p11 = scmp.ne.s32.totalorder %s959_s18, %s863_s12  ;;  %p869_p13 = scmp.lt.s32.totalorder %s863_s12, %s863_s12 }
  0x1d   :  { %p870_p0 = por %p869_p13, %p868_p12 }
  0x1f   :  { %p871_p1 = pnand %p870_p0, %p864_p11 }
  0x21   :  { %874 = shalt.err (!%p871_p1)
}
  0x22   :  { %23 = dma.hbm_to_vmem [thread:$0]  %s1230_s0, 256, %s959_s18, [#allocation4], %s927_s27, %s927_s27, %s928_s28  }
  0x23   :  { %s929_s14 = smov [#allocation8]   ;;  %s875_s19 = scalar_lea.hbm %s1232_s2, 128 }
  0x24   :  { %s42_s15 = sshll.u32 %s929_s14, 4  ;;  %p876_p2 = scmp.ne.s32.totalorder %s1232_s2, %s875_s19  ;;  %s43_s15 = int_to_ptr.vmem [resolvable:$true] %s42_s15 }
  0x25   :  { %p879_p3 = scmp.lt.u32.totalorder %s875_s19, %s1232_s2 }
  0x27   :  { %p881_p4 = pnand %p879_p3, %p876_p2 }
  0x29   :  { %884 = shalt.err (!%p881_p4)
}
  0x2a   :  { %s885_s24 = scalar_lea.vmem %s43_s15, 128  ;;  %p890_p6 = scmp.lt.s32.totalorder %s43_s15, %s43_s15 }
  0x2b   :  { %p886_p5 = scmp.ne.s32.totalorder %s43_s15, %s885_s24  ;;  %p891_p7 = scmp.lt.s32.totalorder %s885_s24, %s885_s24 }
  0x2d   :  { %p892_p8 = por %p891_p7, %p890_p6 }
  0x2f   :  { %p893_p9 = pnand %p892_p8, %p886_p5 }
  0x31   :  { %896 = shalt.err (!%p893_p9)
}
  0x32   :  { %45 = dma.hbm_to_vmem [thread:$0]  %s1232_s2, 128, %s43_s15, [#allocation7]  }
  0x33   :  { %919 = dma.done.wait [#allocation4], 256  }
  0x34   :  { %920 = vsyncadd [#allocation4], 4294967040 }
  0x35   :  { %921 = dma.done.wait [#allocation7], 2176  }
  0x36   :  { %922 = vsyncadd [#allocation7], 4294965120  ;;  %v64_v0 = vld [vmem:[#allocation3] sm:$0xff]  ;;  %v65_v1 = vld [vmem:[#allocation3 + $0x8] sm:$0xff]  ;;  %v930_v4 = vmov 0.0   ;;  %v931_v44 = vmov 1  }
  0x37   :  { %66 = vadd.xlane.f32.xlu0 %v64_v0  ;;  %v59_v2 = vld [vmem:[%s1233_s3] sm:$0xff]  ;;  %v1015_v9 = vld [vmem:[#allocation6] sm:$0xff]  ;;  %v1021_v13 = vld [vmem:[#allocation6 + $0x8] sm:$0xff]  ;;  %765 = vset.pattern.permute.xlu1 %v931_v44  ;;  %v932_v45 = vmov 0   ;;  %s933_s2 = smov [#allocation9]  }
  0x38   :  { %725 = vmatprep.subr.mxu1 %v59_v2  ;;  %v213_v12 = vmul.f32 %v1015_v9, %v1015_v9  ;;  %v1025_v15 = vld [vmem:[#allocation6 + $0x10] sm:$0xff]  ;;  %v214_v16 = vmul.f32 %v1021_v13, %v1021_v13  ;;  %v1031_v18 = vld [vmem:[#allocation6 + $0x18] sm:$0xff]  ;;  %v1033_v19 = vld [vmem:[#allocation6 + $0x20] sm:$0xff]  ;;  %766 = vset.pattern.permute.xlu0 %v932_v45  ;;  %s692_s3 = sshll.u32 %s933_s2, 4  ;;  %s693_s3 = int_to_ptr.vmem [resolvable:$true] %s692_s3 }
  0x39   :  { %726 = vmatpush3.xpose.msra.mxu1 %v59_v2  ;;  %v215_v17 = vmul.f32 %v1025_v15, %v1025_v15  ;;  %v216_v20 = vmul.f32 %v1031_v18, %v1031_v18  ;;  %v217_v21 = vmul.f32 %v1033_v19, %v1033_v19  ;;  %v1039_v22 = vld [vmem:[#allocation6 + $0x28] sm:$0xff]  ;;  %v1041_v23 = vld [vmem:[#allocation6 + $0x30] sm:$0xff]  ;;  %v1047_v26 = vld [vmem:[#allocation6 + $0x38] sm:$0xff]  ;;  %s897_s29 = scalar_lea.vmem %s693_s3, 256  ;;  %p902_p11 = scmp.lt.s32.totalorder %s693_s3, %s693_s3 }
  0x3a   :  { %730 = vmatprep.subr.mxu1 %v59_v2  ;;  %v218_v24 = vmul.f32 %v1039_v22, %v1039_v22  ;;  %v219_v25 = vmul.f32 %v1041_v23, %v1041_v23  ;;  %v1049_v27 = vld [vmem:[#allocation6 + $0x40] sm:$0xff]  ;;  %v220_v28 = vmul.f32 %v1047_v26, %v1047_v26  ;;  %v1055_v30 = vld [vmem:[#allocation6 + $0x48] sm:$0xff]  ;;  %v1057_v31 = vld [vmem:[#allocation6 + $0x50] sm:$0xff]  ;;  %p898_p10 = scmp.ne.s32.totalorder %s693_s3, %s897_s29  ;;  %p903_p12 = scmp.lt.s32.totalorder %s897_s29, %s897_s29 }
  0x3b   :  { %68 = vadd.xlane.f32.xlu0 %v65_v1  ;;  %v221_v29 = vmul.f32 %v1049_v27, %v1049_v27  ;;  %v222_v32 = vmul.f32 %v1055_v30, %v1055_v30  ;;  %v223_v33 = vmul.f32 %v1057_v31, %v1057_v31  ;;  %v1063_v34 = vld [vmem:[#allocation6 + $0x58] sm:$0xff]  ;;  %v1065_v35 = vld [vmem:[#allocation6 + $0x60] sm:$0xff]  ;;  %v1071_v38 = vld [vmem:[#allocation6 + $0x68] sm:$0xff] }
  0x3c   :  { %v224_v36 = vmul.f32 %v1063_v34, %v1063_v34  ;;  %v225_v37 = vmul.f32 %v1065_v35, %v1065_v35  ;;  %v1073_v39 = vld [vmem:[#allocation6 + $0x70] sm:$0xff]  ;;  %v226_v40 = vmul.f32 %v1071_v38, %v1071_v38  ;;  %v1079_v42 = vld [vmem:[#allocation6 + $0x78] sm:$0xff]  ;;  %p904_p13 = por %p903_p12, %p902_p11 }
  0x3d   :  { %v227_v41 = vmul.f32 %v1073_v39, %v1073_v39  ;;  %v228_v43 = vmul.f32 %v1079_v42, %v1079_v42 }
  0x3e   :  { %p905_p0 = pnand %p904_p13, %p898_p10 }
  0xc4   :  { %v67_v3 = vpop.xlane.xlu0 %66 }
  0xc5   :  { %vm70_vm0 = vcmp.eq.f32.partialorder %v67_v3, 0.0 }
  0xc6   :  { %v72_v5 = vsel %vm70_vm0, 1e-08, %v930_v4 }
  0xc7   :  { %v1011_v6 = vadd.f32 %v72_v5, %v64_v0 }
  0xc8   :  { %v69_v7 = vpop.xlane.xlu0 %68 }
  0xc9   :  { %vm71_vm1 = vcmp.eq.f32.partialorder %v69_v7, 0.0  ;;  %v76_v8 = vmul.f32 %v1011_v6, %v1011_v6 }
  0xca   :  { %v73_v10 = vsel %vm71_vm1, 1e-08, %v930_v4 }
  0xcb   :  { %v1017_v11 = vadd.f32 %v73_v10, %v65_v1  ;;  %727 = vmatprep.mubr.f32.mxu1 %v76_v8 }
  0xcd   :  { %v77_v14 = vmul.f32 %v1017_v11, %v1017_v11 }
  0xcf   :  { %728 = vmatmul.mubr.f32.vlgmr.msra.gmra.mrb[0].mxu1 %v77_v14 }
  0xd0   :  { %731 = vmatpush3.xpose.msra.mxu1 %v59_v2  ;;  %732 = vmatprep.mubr.f32.mxu1 %v213_v12 }
  0xd3   :  { %733 = vmatmul.mubr.f32.vlgmr.msra.gmra.mrb[2].mxu1 %v214_v16 }
  0xd4   :  { %735 = vmatprep.mubr.f32.mxu1 %v215_v17 }
  0xd7   :  { %736 = vmatmul.mubr.f32.gmra.mrb[4].mxu1 %v216_v20 }
  0xd8   :  { %738 = vmatprep.mubr.f32.mxu1 %v217_v21 }
  0xdb   :  { %739 = vmatmul.mubr.f32.gmra.mrb[6].mxu1 %v218_v24 }
  0xdc   :  { %741 = vmatprep.mubr.f32.mxu1 %v219_v25 }
  0xdf   :  { %742 = vmatmul.mubr.f32.gmra.mrb[8].mxu1 %v220_v28 }
  0xe0   :  { %744 = vmatprep.mubr.f32.mxu1 %v221_v29 }
  0xe3   :  { %745 = vmatmul.mubr.f32.gmra.mrb[10].mxu1 %v222_v32 }
  0xe4   :  { %747 = vmatprep.mubr.f32.mxu1 %v223_v33 }
  0xe7   :  { %748 = vmatmul.mubr.f32.gmra.mrb[12].mxu1 %v224_v36 }
  0xe8   :  { %750 = vmatprep.mubr.f32.mxu1 %v225_v37 }
  0xeb   :  { %751 = vmatmul.mubr.f32.gmra.mrb[14].mxu1 %v226_v40 }
  0xec   :  { %753 = vmatprep.mubr.f32.mxu1 %v227_v41 }
  0xef   :  { %754 = vmatmul.mubr.f32.gmra.mrb[16].mxu1 %v228_v43 }
 0x1a2   :  { %v1085_v46 = vpop.f32.mrb[0].mxu1 }
 0x1a3   :  { %v1087_v47 = vpop.f32.mrb[1].mxu1  ;;  %v154_v41 = vmax.f32 %v1085_v46, 1e-16 }
 0x1a4   :  { %v153_v33 = vmax.f32 %v1087_v47, 1e-16 }
 0x1a6   :  { %v734_v48 = vpop.f32.mrb[2].mxu1 }
 0x1a7   :  { %v375_v49 = vmax.f32 %v734_v48, 1e-16  ;;  %v295_v50 = vpop.f32.mrb[3].mxu1 }
 0x1a8   :  { %v374_v51 = vmax.f32 %v295_v50, 1e-16 }
 0x1a9   :  { %795 = vrsqrt.f32 %v375_v49 }
 0x1aa   :  { %797 = vrsqrt.f32 %v374_v51  ;;  %v737_v52 = vpop.f32.mrb[4].mxu1 }
 0x1ab   :  { %v305_v53 = vpop.f32.mrb[5].mxu1  ;;  %v377_v56 = vmax.f32 %v737_v52, 1e-16 }
 0x1ac   :  { %v376_v4 = vmax.f32 %v305_v53, 1e-16 }
 0x1ad   :  { %799 = vrsqrt.f32 %v377_v56 }
 0x1ae   :  { %v740_v54 = vpop.f32.mrb[6].mxu1 }
 0x1af   :  { %v1089_v55 = vpop.f32.mrb[7].mxu1  ;;  %v379_v21 = vmax.f32 %v740_v54, 1e-16 }
 0x1b0   :  { %v378_v37 = vmax.f32 %v1089_v55, 1e-16 }
 0x1b2   :  { %v1091_v57 = vpop.f32.mrb[8].mxu1 }
 0x1b3   :  { %v796_v58 = vpop.eup %795  ;;  %v325_v59 = vpop.f32.mrb[9].mxu1  ;;  %v381_v47 = vmax.f32 %v1091_v57, 1e-16 }
 0x1b4   :  { %v798_v60 = vpop.eup %797  ;;  %v380_v61 = vmax.f32 %v325_v59, 1e-16  ;;  %555 = vperm.xlu1 %765, %v796_v58  }
 0x1b5   :  { %428 = vperm.xlu0 %766, %v798_v60  }
 0x1b6   :  { %801 = vrsqrt.f32 %v380_v61  ;;  %v746_v62 = vpop.f32.mrb[10].mxu1  ;;  %v58_v61 = vld [vmem:[#allocation8] sm:$0xff] }
 0x1b7   :  { %v383_v63 = vmax.f32 %v746_v62, 1e-16  ;;  %v335_v0 = vpop.f32.mrb[11].mxu1  ;;  %v800_v8 = vpop.eup %799 }
 0x1b8   :  { %551 = vperm.xlu1 %765, %v798_v60   ;;  %v382_v1 = vmax.f32 %v335_v0, 1e-16 }
 0x1b9   :  { %803 = vrsqrt.f32 %v383_v63 }
 0x1ba   :  { %v1093_v2 = vpop.f32.mrb[12].mxu1  ;;  %805 = vrsqrt.f32 %v382_v1 }
 0x1bb   :  { %v345_v3 = vpop.f32.mrb[13].mxu1  ;;  %807 = vrsqrt.f32 %v376_v4  ;;  %v385_v54 = vmax.f32 %v1093_v2, 1e-16 }
 0x1bc   :  { %767 = vset.pattern.permute.xlu1 %v932_v45  ;;  %v384_v5 = vmax.f32 %v345_v3, 1e-16 }
 0x1bd   :  { %433 = vperm.xlu1 %767, %v796_v58   ;;  %v159_v58 = vlaneseq }
 0x1be   :  { %v752_v7 = vpop.f32.mrb[14].mxu1  ;;  %809 = vrsqrt.f32 %v384_v5 }
 0x1bf   :  { %v355_v10 = vpop.f32.mrb[15].mxu1  ;;  %v387_v14 = vmax.f32 %v752_v7, 1e-16  ;;  %v160_v59 = vshrl.u32 %v159_v58, 7 }
 0x1c0   :  { %v1096_v12 = vpop.eup %801  ;;  %v386_v25 = vmax.f32 %v355_v10, 1e-16 }
 0x1c1   :  { %768 = vset.pattern.permute.xlu1 %v931_v44  ;;  %458 = vperm.xlu0 %766, %v1096_v12   ;;  %811 = vrsqrt.f32 %v387_v14  ;;  %v180_v60 = vsub.s32 1, %v160_v59  ;;  %v161_v0 = vsub.s32 0, %v160_v59 }
 0x1c2   :  { %563 = vperm.xlu1 %768, %v800_v8   ;;  %v1100_v16 = vpop.f32.mrb[16].mxu1  ;;  %813 = vrsqrt.f32 %v379_v21 }
 0x1c3   :  { %v1102_v17 = vpop.eup %803  ;;  %v365_v20 = vpop.f32.mrb[17].mxu1  ;;  %815 = vrsqrt.f32 %v386_v25  ;;  %v389_v56 = vmax.f32 %v1100_v16, 1e-16  ;;  %v1139_v62 = vrot.slane %v58_v61, %v180_v60 }
 0x1c4   :  { %v806_v24 = vpop.eup %805  ;;  %v388_v32 = vmax.f32 %v365_v20, 1e-16 }
 0x1c5   :  { %473 = vperm.xlu0 %766, %v1102_v17   ;;  %v808_v28 = vpop.eup %807  ;;  %v535_v1 = vmul.f32 %v1021_v13, %v1139_v62  ;;  %v534_v2 = vmul.f32 %v1015_v9, %v1139_v62  ;;  %v536_v25 = vmul.f32 %v1025_v15, %v1139_v62 }
 0x1c6   :  { %769 = vset.pattern.permute.xlu1 %v932_v45  ;;  %817 = vrsqrt.f32 %v388_v32 }
 0x1c7   :  { %443 = vperm.xlu1 %769, %v800_v8   ;;  %819 = vrsqrt.f32 %v153_v33 }
 0x1c8   :  { %v810_v29 = vpop.eup %809  ;;  %821 = vrsqrt.f32 %v378_v37 }
 0x1c9   :  { %779 = vset.pattern.permute.xlu0 %v931_v44  ;;  %823 = vrsqrt.f32 %v154_v41 }
 0x1ca   :  { %583 = vperm.xlu0 %779, %v806_v24   ;;  %825 = vrsqrt.f32 %v381_v47 }
 0x1cb   :  { %770 = vset.pattern.permute.xlu1 %v931_v44  ;;  %v812_v36 = vpop.eup %811  ;;  %827 = vrsqrt.f32 %v385_v54 }
 0x1cc   :  { %559 = vperm.xlu1 %770, %v808_v28   ;;  %v814_v40 = vpop.eup %813  ;;  %829 = vrsqrt.f32 %v389_v56 }
 0x1cd   :  { %v816_v43 = vpop.eup %815 }
 0x1ce   :  { %784 = vset.pattern.permute.xlu0 %v932_v45 }
 0x1cf   :  { %478 = vperm.xlu0 %784, %v810_v29  }
 0x1d0   :  { %771 = vset.pattern.permute.xlu1 %v932_v45  ;;  %v818_v48 = vpop.eup %817 }
 0x1d1   :  { %438 = vperm.xlu1 %771, %v808_v28   ;;  %v820_v49 = vpop.eup %819 }
 0x1d2   :  { %v822_v46 = vpop.eup %821  ;;  %v157_v50 = vmul.f32 0.5, %v820_v49  ;;  %v538_v49 = vmul.f32 %v1033_v19, %v1139_v62 }
 0x1d3   :  { %493 = vperm.xlu0 %784, %v812_v36   ;;  %v824_v51 = vpop.eup %823 }
 0x1d4   :  { %v158_v52 = vmul.f32 0.5, %v824_v51  ;;  %v826_v53 = vpop.eup %825 }
 0x1d5   :  { %772 = vset.pattern.permute.xlu1 %v931_v44  ;;  %v828_v55 = vpop.eup %827 }
 0x1d6   :  { %571 = vperm.xlu1 %772, %v814_v40   ;;  %v830_v57 = vpop.eup %829 }
 0x1d7   :  { %785 = vset.pattern.permute.xlu0 %v931_v44 }
 0x1d8   :  { %599 = vperm.xlu0 %785, %v816_v43  }
 0x1da   :  { %773 = vset.pattern.permute.xlu1 %v932_v45 }
 0x1db   :  { %453 = vperm.xlu1 %773, %v814_v40  }
 0x1dc   :  { %790 = vset.pattern.permute.xlu0 %v932_v45 }
 0x1dd   :  { %498 = vperm.xlu0 %790, %v818_v48  }
 0x1df   :  { %774 = vset.pattern.permute.xlu1 %v931_v44 }
 0x1e0   :  { %567 = vperm.xlu1 %774, %v822_v46  }
 0x1e1   :  { %791 = vset.pattern.permute.xlu0 %v931_v44 }
 0x1e2   :  { %185 = vperm.xlu0 %791, %v157_v50  }
 0x1e4   :  { %775 = vset.pattern.permute.xlu1 %v932_v45 }
 0x1e5   :  { %448 = vperm.xlu1 %775, %v822_v46  }
 0x1e6   :  { %793 = vset.pattern.permute.xlu0 %v932_v45 }
 0x1e7   :  { %172 = vperm.xlu0 %793, %v158_v52  }
 0x1e9   :  { %776 = vset.pattern.permute.xlu1 %v931_v44 }
 0x1ea   :  { %579 = vperm.xlu1 %776, %v826_v53  }
 0x1eb   :  { %794 = vset.pattern.permute.xlu0 %v931_v44 }
 0x1ee   :  { %777 = vset.pattern.permute.xlu1 %v932_v45 }
 0x1ef   :  { %463 = vperm.xlu1 %777, %v826_v53  }
 0x1f3   :  { %778 = vset.pattern.permute.xlu1 %v931_v44 }
 0x1f4   :  { %575 = vperm.xlu1 %778, %v1096_v12  }
 0x1f8   :  { %587 = vperm.xlu1 %778, %v1102_v17  }
 0x1fc   :  { %780 = vset.pattern.permute.xlu1 %v932_v45 }
 0x1fd   :  { %468 = vperm.xlu1 %780, %v806_v24   ;;  %v537_v24 = vmul.f32 %v1031_v18, %v1139_v62 }
 0x201   :  { %781 = vset.pattern.permute.xlu1 %v931_v44 }
 0x202   :  { %595 = vperm.xlu1 %781, %v828_v55  }
 0x206   :  { %782 = vset.pattern.permute.xlu1 %v932_v45 }
 0x207   :  { %483 = vperm.xlu1 %782, %v828_v55  }
 0x20b   :  { %783 = vset.pattern.permute.xlu1 %v931_v44 }
 0x20c   :  { %591 = vperm.xlu1 %783, %v810_v29  }
 0x210   :  { %603 = vperm.xlu1 %783, %v812_v36  }
 0x214   :  { %786 = vset.pattern.permute.xlu1 %v932_v45 }
 0x215   :  { %488 = vperm.xlu1 %786, %v816_v43  }
 0x219   :  { %787 = vset.pattern.permute.xlu1 %v931_v44 }
 0x21a   :  { %611 = vperm.xlu1 %787, %v830_v57  }
 0x21e   :  { %788 = vset.pattern.permute.xlu1 %v932_v45 }
 0x21f   :  { %503 = vperm.xlu1 %788, %v830_v57  }
 0x223   :  { %789 = vset.pattern.permute.xlu1 %v931_v44  ;;  %v1145_v44 = vrot.slane %v58_v61, %v161_v0  ;;  %v542_v0 = vmul.f32 %v1049_v27, %v1139_v62 }
 0x224   :  { %607 = vperm.xlu1 %789, %v818_v48   ;;  %v539_v48 = vmul.f32 %v1039_v22, %v1139_v62 }
 0x225   :  { %v411_v7 = vmul.f32 %v1021_v13, %v1145_v44  ;;  %v413_v13 = vmul.f32 %v1031_v18, %v1145_v44  ;;  %v412_v32 = vmul.f32 %v1025_v15, %v1145_v44  ;;  %v415_v15 = vmul.f32 %v1039_v22, %v1145_v44 }
 0x226   :  { %v414_v51 = vmul.f32 %v1033_v19, %v1145_v44  ;;  %v417_v61 = vmul.f32 %v1047_v26, %v1145_v44  ;;  %v541_v22 = vmul.f32 %v1047_v26, %v1139_v62  ;;  %v540_v19 = vmul.f32 %v1041_v23, %v1139_v62 }
 0x228   :  { %189 = vperm.xlu1 %789, %v158_v52  }
 0x22c   :  { %792 = vset.pattern.permute.xlu1 %v932_v45  ;;  %v410_v45 = vmul.f32 %v1015_v9, %v1145_v44 }
 0x22d   :  { %167 = vperm.xlu1 %792, %v157_v50  }
 0x233   :  { %v556_v63 = vpop.permute.xlu1 %555 }
 0x234   :  { %v615_v4 = vmul.f32 %v556_v63, %v535_v1  ;;  %v429_v8 = vpop.permute.xlu0 %428  ;;  %v416_v63 = vmul.f32 %v1041_v23, %v1145_v44  ;;  %v419_v23 = vmul.f32 %v1055_v30, %v1145_v44 }
 0x235   :  { %v506_v14 = vmul.f32 %v429_v8, %v410_v45 }
 0x237   :  { %v552_v3 = vpop.permute.xlu1 %551 }
 0x238   :  { %v614_v5 = vmul.f32 %v552_v3, %v534_v2 }
 0x23a   :  { %v630_v10 = vpack.c.bf16 %v615_v4, %v614_v5  ;;  %v543_v5 = vmul.f32 %v1055_v30, %v1139_v62  ;;  %v545_v30 = vmul.f32 %v1063_v34, %v1139_v62 }
 0x23c   :  { %v434_v12 = vpop.permute.xlu1 %433  ;;  %640 = vmatprep.subr.bf16.mxu0 %v630_v10 }
 0x23d   :  { %v507_v16 = vmul.f32 %v434_v12, %v411_v7 }
 0x23f   :  { %v522_v17 = vpack.c.bf16 %v507_v16, %v506_v14  ;;  %v418_v16 = vmul.f32 %v1049_v27, %v1145_v44  ;;  %v544_v27 = vmul.f32 %v1057_v31, %v1139_v62 }
 0x240   :  { %v459_v57 = vpop.permute.xlu0 %458 }
 0x241   :  { %v564_v20 = vpop.permute.xlu1 %563  ;;  %641 = vmatpush1.bf16.xpose.msra.mxu0 %v522_v17  ;;  %v512_v45 = vmul.f32 %v459_v57, %v416_v63 }
 0x242   :  { %v617_v28 = vmul.f32 %v564_v20, %v537_v24 }
 0x244   :  { %v474_v60 = vpop.permute.xlu0 %473 }
 0x246   :  { %v444_v21 = vpop.permute.xlu1 %443 }
 0x247   :  { %v509_v37 = vmul.f32 %v444_v21, %v413_v13  ;;  %v515_v21 = vmul.f32 %v474_v60, %v419_v23  ;;  %v425_v60 = vmul.f32 %v1079_v42, %v1145_v44 }
 0x249   :  { %v584_v7 = vpop.permute.xlu0 %583 }
 0x24a   :  { %v622_v8 = vmul.f32 %v584_v7, %v542_v0 }
 0x24b   :  { %v560_v9 = vpop.permute.xlu1 %559 }
 0x24c   :  { %v616_v29 = vmul.f32 %v560_v9, %v536_v25 }
 0x24e   :  { %v631_v33 = vpack.c.bf16 %v617_v28, %v616_v29  ;;  %v479_v9 = vpop.permute.xlu0 %478 }
 0x250   :  { %v439_v36 = vpop.permute.xlu1 %438  ;;  %642 = vmatprep.subr.bf16.mxu0 %v631_v33  ;;  %v420_v33 = vmul.f32 %v1057_v31, %v1145_v44  ;;  %v423_v31 = vmul.f32 %v1071_v38, %v1145_v44 }
 0x251   :  { %v508_v40 = vmul.f32 %v439_v36, %v412_v32  ;;  %v421_v32 = vmul.f32 %v1063_v34, %v1145_v44  ;;  %v546_v36 = vmul.f32 %v1065_v35, %v1139_v62 }
 0x252   :  { %v494_v13 = vpop.permute.xlu0 %493 }
 0x253   :  { %v523_v41 = vpack.c.bf16 %v509_v37, %v508_v40 }
 0x255   :  { %v572_v43 = vpop.permute.xlu1 %571  ;;  %643 = vmatpush1.bf16.xpose.msra.mxu0 %v523_v41 }
 0x256   :  { %v619_v18 = vmul.f32 %v572_v43, %v539_v48  ;;  %v516_v48 = vmul.f32 %v479_v9, %v420_v33 }
 0x25a   :  { %v454_v47 = vpop.permute.xlu1 %453 }
 0x25b   :  { %v511_v54 = vmul.f32 %v454_v47, %v415_v15  ;;  %v547_v47 = vmul.f32 %v1071_v38, %v1139_v62  ;;  %v549_v38 = vmul.f32 %v1079_v42, %v1139_v62 }
 0x25f   :  { %v568_v46 = vpop.permute.xlu1 %567 }
 0x260   :  { %v618_v50 = vmul.f32 %v568_v46, %v538_v49  ;;  %v600_v49 = vpop.permute.xlu0 %599 }
 0x261   :  { %v626_v46 = vmul.f32 %v600_v49, %v546_v36 }
 0x262   :  { %v632_v52 = vpack.c.bf16 %v619_v18, %v618_v50 }
 0x264   :  { %v449_v53 = vpop.permute.xlu1 %448  ;;  %644 = vmatprep.subr.bf16.mxu0 %v632_v52 }
 0x265   :  { %v510_v55 = vmul.f32 %v449_v53, %v414_v51  ;;  %v422_v51 = vmul.f32 %v1065_v35, %v1145_v44  ;;  %v424_v35 = vmul.f32 %v1073_v39, %v1145_v44 }
 0x267   :  { %v524_v56 = vpack.c.bf16 %v511_v54, %v510_v55  ;;  %v519_v54 = vmul.f32 %v494_v13, %v423_v31 }
 0x269   :  { %v580_v58 = vpop.permute.xlu1 %579  ;;  %645 = vmatpush1.bf16.xpose.msra.mxu0 %v524_v56 }
 0x26a   :  { %v621_v3 = vmul.f32 %v580_v58, %v541_v22  ;;  %v499_v58 = vpop.permute.xlu0 %498 }
 0x26e   :  { %v464_v59 = vpop.permute.xlu1 %463  ;;  %v186_v63 = vpop.permute.xlu0 %185 }
 0x26f   :  { %v513_v1 = vmul.f32 %v464_v59, %v417_v61  ;;  %v548_v61 = vmul.f32 %v1073_v39, %v1139_v62 }
 0x271   :  { %v525_v10 = vpack.c.bf16 %v513_v1, %v512_v45 }
 0x272   :  { %v173_v39 = vpop.permute.xlu0 %172 }
 0x273   :  { %v576_v2 = vpop.permute.xlu1 %575 }
 0x274   :  { %v620_v4 = vmul.f32 %v576_v2, %v540_v19  ;;  %v520_v2 = vmul.f32 %v499_v58, %v424_v35 }
 0x276   :  { %v633_v26 = vpack.c.bf16 %v621_v3, %v620_v4  ;;  %v182_v3 = vmul.f32 %v1139_v62, %v1011_v6 }
 0x277   :  { %v588_v12 = vpop.permute.xlu1 %587 }
 0x278   :  { %v623_v14 = vmul.f32 %v588_v12, %v543_v5  ;;  %646 = vmatprep.subr.bf16.mxu0 %v633_v26  ;;  %v183_v5 = vmul.f32 %v1139_v62, %v1017_v11  ;;  %v192_v7 = vmul.f32 %v186_v63, %v182_v3  ;;  %v163_v12 = vmul.f32 %v1145_v44, %v1011_v6 }
 0x279   :  { %647 = vmatpush1.bf16.xpose.msra.mxu0 %v525_v10  ;;  %v164_v10 = vmul.f32 %v1145_v44, %v1017_v11 }
 0x27a   :  { %v634_v17 = vpack.c.bf16 %v623_v14, %v622_v8 }
 0x27b   :  { %v176_v23 = vmul.f32 %v173_v39, %v164_v10 }
 0x27c   :  { %v469_v20 = vpop.permute.xlu1 %468  ;;  %648 = vmatprep.subr.bf16.mxu0 %v634_v17 }
 0x27d   :  { %v514_v24 = vmul.f32 %v469_v20, %v418_v16 }
 0x27f   :  { %v526_v25 = vpack.c.bf16 %v515_v21, %v514_v24 }
 0x281   :  { %v596_v28 = vpop.permute.xlu1 %595  ;;  %649 = vmatpush1.bf16.xpose.msra.mxu0 %v526_v25 }
 0x282   :  { %v625_v41 = vmul.f32 %v596_v28, %v545_v30 }
 0x286   :  { %v484_v29 = vpop.permute.xlu1 %483 }
 0x287   :  { %v517_v37 = vmul.f32 %v484_v29, %v421_v32 }
 0x289   :  { %v527_v18 = vpack.c.bf16 %v517_v37, %v516_v48 }
 0x28b   :  { %v592_v40 = vpop.permute.xlu1 %591 }
 0x28c   :  { %v624_v43 = vmul.f32 %v592_v40, %v544_v27 }
 0x28e   :  { %v635_v34 = vpack.c.bf16 %v625_v41, %v624_v43 }
 0x28f   :  { %v604_v50 = vpop.permute.xlu1 %603 }
 0x290   :  { %v627_v15 = vmul.f32 %v604_v50, %v547_v47  ;;  %650 = vmatprep.subr.bf16.mxu0 %v635_v34 }
 0x291   :  { %651 = vmatpush1.bf16.xpose.msra.mxu0 %v527_v18 }
 0x292   :  { %v636_v52 = vpack.c.bf16 %v627_v15, %v626_v46 }
 0x294   :  { %v489_v53 = vpop.permute.xlu1 %488  ;;  %652 = vmatprep.subr.bf16.mxu0 %v636_v52 }
 0x295   :  { %v518_v55 = vmul.f32 %v489_v53, %v422_v51 }
 0x297   :  { %v528_v56 = vpack.c.bf16 %v519_v54, %v518_v55 }
 0x299   :  { %v612_v57 = vpop.permute.xlu1 %611  ;;  %653 = vmatpush1.bf16.xpose.msra.mxu0 %v528_v56 }
 0x29a   :  { %v629_v0 = vmul.f32 %v612_v57, %v549_v38 }
 0x29e   :  { %v504_v59 = vpop.permute.xlu1 %503 }
 0x29f   :  { %v521_v22 = vmul.f32 %v504_v59, %v425_v60 }
 0x2a1   :  { %v529_v42 = vpack.c.bf16 %v521_v22, %v520_v2 }
 0x2a3   :  { %v608_v19 = vpop.permute.xlu1 %607 }
 0x2a4   :  { %v628_v1 = vmul.f32 %v608_v19, %v548_v61 }
 0x2a6   :  { %v637_v4 = vpack.c.bf16 %v629_v0, %v628_v1 }
 0x2a7   :  { %v190_v45 = vpop.permute.xlu1 %189 }
 0x2a8   :  { %v193_v8 = vmul.f32 %v190_v45, %v183_v5  ;;  %654 = vmatprep.subr.bf16.mxu0 %v637_v4 }
 0x2a9   :  { %655 = vmatpush1.bf16.xpose.msra.mxu0 %v529_v42 }
 0x2aa   :  { %v194_v26 = vpack.c.bf16 %v193_v8, %v192_v7 }
 0x2ac   :  { %v168_v14 = vpop.permute.xlu1 %167  ;;  %672 = vmatprep.mubr.bf16.mxu0 %v194_v26 }
 0x2ad   :  { %v175_v16 = vmul.f32 %v168_v14, %v163_v12 }
 0x2af   :  { %v177_v17 = vpack.c.bf16 %v176_v23, %v175_v16 }
 0x2b1   :  { %673 = vmatmul.mubr.bf16.vlgmr.msra.gmra.mrb[0].mxu0 %v177_v17 }
 0x384   :  { %v674_v62 = vpop.f32.mrb[0].mxu0 }
 0x385   :  { %vm681_vm2 = vcmp.lt.f32.partialorder %v674_v62, 0.1  ;;  %v676_v20 = vpop.f32.mrb[1].mxu0 }
 0x386   :  { %v683_v21 = vsel %vm681_vm2, 0.0, %v674_v62  ;;  %v677_v24 = vpop.f32.mrb[2].mxu0 }
 0x387   :  { %685 = vst [vmem:[#allocation9] sm:$0xff] %v683_v21  ;;  %vm682_vm3 = vcmp.lt.f32.partialorder %v677_v24, 0.1  ;;  %v679_v25 = vpop.f32.mrb[3].mxu0 }
 0x388   :  { %v684_v11 = vsel %vm682_vm3, 0.0, %v677_v24 }
 0x389   :  { %686 = vst [vmem:[#allocation9 + $0x8] sm:$0xff] %v684_v11 }
 0x38a   :  { %908 = shalt.err (!%p905_p0)
}
 0x38b   :  { %s909_s6 = scalar_lea.hbm %s1234_s4, 256 }
 0x38c   :  { %p910_p1 = scmp.ne.s32.totalorder %s1234_s4, %s909_s6  ;;  %p913_p2 = scmp.lt.u32.totalorder %s909_s6, %s1234_s4 }
 0x38e   :  { %p915_p3 = pnand %p913_p2, %p910_p1 }
 0x390   :  { %918 = shalt.err (!%p915_p3)
}
 0x391   :  { %698 = dma.vmem_to_hbm [thread:$0]  %s693_s3, 256, %s1234_s4, [#allocation5], %s927_s27, %s927_s27, %s928_s28  }
 0x392   :  { %923 = dma.done.wait [#allocation5], 256  }
 0x393   :  { %924 = vsyncadd [#allocation5], 4294967040 }
 0x394   :  { %702 = vsyncpa [#allocation4], 1 }
 0x395   :  { %703 = vsyncpa [#allocation7], 1 }
 0x396   :  { %704 = vsyncpa [#allocation5], 1 }

</bundles_post_ra>
